<compile_context>
chip_gen: v6e
topology: v6e:2x2x1
jax: 0.10.0
libtpu: 0.0.40
codegen_flags: <defaults>
</compile_context>

<pallas_src>
import functools

import jax
import jax.numpy as jnp
from jax.experimental import pallas as pl
from jax.experimental.pallas import tpu as pltpu


def _round_up(x, mult):
    return (x + mult - 1) // mult * mult


def ghh_kernel(*refs, n_out, s, m, g_pad, use_r):
    """One (batch-tile, K-tile) grid step of the GHH forward pass."""
    if use_r:
        x_ref, w_ref, b_ref, r_ref, out_ref, acc_ref = refs
    else:
        x_ref, w_ref, b_ref, out_ref, acc_ref = refs

    k = pl.program_id(1)

    @pl.when(k == 0)
    def _init():
        # Fold the bias into the accumulator init (added exactly once).
        acc_ref[...] = jnp.broadcast_to(b_ref[...], acc_ref.shape)

    # MXU hot path: x is cast to bf16 on the VPU right before the matmul, so
    # the wrapper never makes an extra HBM cast/pad pass over x.
    acc_ref[...] += jnp.dot(
        x_ref[...].astype(jnp.bfloat16), w_ref[...],
        preferred_element_type=jnp.float32,
    )

    @pl.when(k == pl.num_programs(1) - 1)
    def _finalize():
        feats = acc_ref[...]                       # (TB, m * g_pad), f32
        # Columns are laid out (m, s, n_out) with each m-group padded to a
        # 128-lane boundary: max over m = unrolled maximum over m lane-aligned
        # slices of width g_pad.
        mx = feats[:, 0:g_pad]
        for kk in range(1, m):
            mx = jnp.maximum(mx, feats[:, kk * g_pad:(kk + 1) * g_pad])
        if use_r:
            # Signed sum over s via a tiny +/-1 matmul that also scatters the
            # n_out results into a lane-dense 128-wide output block.
            out_ref[...] = jnp.dot(mx, r_ref[...],
                                   preferred_element_type=jnp.float32)
        else:
            # n_out is a multiple of 128: the s slices are lane-aligned, so a
            # pure-VPU signed add/sub is cheaper and needs no resident r.
            acc = mx[:, 0:n_out]
            for si in range(1, s):
                sl = mx[:, si * n_out:(si + 1) * n_out]
                acc = acc + sl if si % 2 == 0 else acc - sl
            out_ref[...] = acc


def ghh_forward(x, w, b, *, n_out, s, m, batch_tile=512):
    """GHH forward.

    x: any shape with leading batch dim (flattened like torch x.view(B, -1)).
    w: (n_in, n_out*s*m)  -- transposed nn.Linear weight.
    b: (n_out*s*m,) or (1, n_out*s*m).
    Returns (B, n_out) float32.
    """
    B = x.shape[0]
    x_flat = x.reshape(B, -1)
    n_in = x_flat.shape[1]
    D = n_out * s * m
    assert w.shape == (n_in, D)

    g = s * n_out
    g_pad = _round_up(g, 128)          # lane-align each m-group
    D_pad = m * g_pad
    use_r = (n_out % 128 != 0)
    n_pad = _round_up(n_out, 128) if use_r else n_out

    # ---- parameter prep (one-time layout plumbing) --------------------------
    # Fused Linear columns (n_out, s, m) -> (m, s, n_out), each m-group padded
    # to g_pad lanes. Padded lanes are zero-weight / zero-bias and are ignored
    # by the reduction, so the math is unchanged.
    w3 = w.reshape(n_in, n_out, s, m).transpose(0, 3, 2, 1).reshape(n_in, m, g)
    b3 = jnp.asarray(b).reshape(n_out, s, m).transpose(2, 1, 0).reshape(m, g)
    if g_pad != g:
        w3 = jnp.zeros((n_in, m, g_pad), w.dtype).at[:, :, :g].set(w3)
        b3 = jnp.zeros((m, g_pad), b3.dtype).at[:, :g].set(b3)
    w_p = w3.reshape(n_in, D_pad).astype(jnp.bfloat16)
    b_p = b3.reshape(1, D_pad).astype(jnp.float32)

    if use_r:
        # +/-1 reduce/scatter matrix: out[:, o] = sum_si delta_si * mx[:, si*n_out+o]
        rows = jnp.arange(g)
        deltas = jnp.where((rows // n_out) % 2 == 0, 1.0, -1.0).astype(jnp.float32)
        r = jnp.zeros((g_pad, n_pad), jnp.float32).at[rows, rows % n_out].set(deltas)

    # ---- tiling (generation-aware VMEM budget) -------------------------------
    x_bytes = jnp.dtype(x_flat.dtype).itemsize
    try:
        vmem_cap = int(pltpu.get_tpu_info().vmem_capacity_bytes)
    except Exception:
        vmem_cap = 64 << 20            # assume smallest per-core VMEM (v7x)
    budget = int(vmem_cap * 0.70)

    TB = min(batch_tile, _round_up(max(B, 1), 16))     # B-aware batch tile
    if B > 256 and _round_up(B, TB) // TB < 2:
        # v7x has 2 TensorCores: give the "parallel" batch axis >= 2 tiles.
        TB = _round_up(max(TB // 2, 16), 16)

    def footprint(tb, tk):
        return (tb * D_pad * 4                                 # f32 accumulator
                + 2 * tk * D_pad * 2                           # w (dbl-buffered bf16)
                + 2 * tb * tk * x_bytes                        # x (dbl-buffered, native)
                + 2 * tb * n_pad * 4                           # out (dbl-buffered)
                + 2 * D_pad * 4                                # bias
                + (2 * g_pad * n_pad * 4 if use_r else 0))     # +/-1 reduce matrix

    if footprint(TB, n_in) <= budget:
        TK = K_total = n_in            # whole weight matrix resident: DMA'd once
    else:
        K_total = _round_up(n_in, 128)
        TK = 128
        while TK * 2 <= K_total and footprint(TB, TK * 2) <= budget:
            TK *= 2
        while TB > 16 and footprint(TB, TK) > budget:
            # v7x guard: very large fused width -> shrink batch tile so the
            # accumulator + buffers stay inside the 64 MiB VMEM.
            TB = _round_up(max(TB // 2, 16), 16)
        K_total = _round_up(K_total, TK)

    B_pad = _round_up(max(B, 1), TB)
    if B_pad != B or K_total != n_in:
        # Only the ragged last batch tile / K remainder is zero-padded.
        x_flat = jnp.pad(x_flat, ((0, B_pad - B), (0, K_total - n_in)))
    if K_total != n_in:
        w_p = jnp.pad(w_p, ((0, K_total - n_in), (0, 0)))

    grid = (B_pad // TB, K_total // TK)
    kernel = functools.partial(ghh_kernel, n_out=n_out, s=s, m=m,
                               g_pad=g_pad, use_r=use_r)

    in_specs = [
        pl.BlockSpec((TB, TK), lambda i, k: (i, k)),     # x tile (streamed)
        pl.BlockSpec((TK, D_pad), lambda i, k: (k, 0)),  # w block (resident if 1 K-block)
        pl.BlockSpec((1, D_pad), lambda i, k: (0, 0)),   # bias (resident)
    ]
    args = [x_flat, w_p, b_p]
    if use_r:
        in_specs.append(pl.BlockSpec((g_pad, n_pad), lambda i, k: (0, 0)))
        args.append(r)

    vmem_limit = max(footprint(TB, TK) + (8 << 20), 32 << 20)
    vmem_limit = min(vmem_limit, int(vmem_cap * 0.85))

    out = pl.pallas_call(
        kernel,
        out_shape=jax.ShapeDtypeStruct((B_pad, n_pad), jnp.float32),
        grid_spec=pltpu.PrefetchScalarGridSpec(
            num_scalar_prefetch=0,
            grid=grid,
            in_specs=in_specs,
            out_specs=pl.BlockSpec((TB, n_pad), lambda i, k: (i, 0)),
            scratch_shapes=[pltpu.VMEM((TB, D_pad), jnp.float32)],
        ),
        compiler_params=pltpu.CompilerParams(
            dimension_semantics=("parallel", "arbitrary"),
            vmem_limit_bytes=int(vmem_limit),
        ),
    )(*args)

    return out[:B, :n_out]


def ghh_reference(x, w, b, *, n_out, s, m):
    # Same math as the PyTorch module, with bf16 matmul inputs / f32 accumulate
    # to match the kernel's precision choices.
    B = x.shape[0]
    x_flat = x.reshape(B, -1)
    feats = jnp.dot(
        x_flat.astype(jnp.bfloat16), w.astype(jnp.bfloat16),
        preferred_element_type=jnp.float32,
    ) + jnp.asarray(b).reshape(1, -1).astype(jnp.float32)
    feats = feats.reshape(B, n_out, s, m)
    max_feats = jnp.max(feats, axis=3)
    deltas = jnp.where(jnp.arange(s) % 2 == 0, 1.0, -1.0)
    return jnp.sum(max_feats * deltas[None, None, :], axis=2)


if __name__ == "__main__":
    # Small shapes consistent with the module: x is NCHW, flattened internally.
    B, C, H, W = 2, 4, 8, 8
    n_in = C * H * W          # 256
    n_out, s, m = 8, 4, 4     # Linear output dim = 8*4*4 = 128

    key = jax.random.PRNGKey(0)
    kx, kw, kb = jax.random.split(key, 3)

    x = jax.random.normal(kx, (B, C, H, W), dtype=jnp.float32)

    # PyTorch-style Linear init, stored pre-transposed as (n_in, n_out*s*m).
    bound = 1.0 / jnp.sqrt(jnp.float32(n_in))
    w = jax.random.uniform(
        kw, (n_in, n_out * s * m), minval=-bound, maxval=bound, dtype=jnp.float32
    )
    b = jax.random.uniform(
        kb, (1, n_out * s * m), minval=-bound, maxval=bound, dtype=jnp.float32
    )

    out = ghh_forward(x, w, b, n_out=n_out, s=s, m=m)
    out = jax.block_until_ready(out)

    ref = ghh_reference(x, w, b, n_out=n_out, s=s, m=m)
    assert out.shape == (B, n_out)
    assert jnp.allclose(out, ref, atol=1e-3, rtol=1e-3), "mismatch vs reference"

    print("KERNEL_OK")
</pallas_src>

<mosaic_0001>
module attributes {stable_mosaic.version = 11 : i64} {
  func.func @ghh_kernel(%arg0: i32, %arg1: i32, %arg2: memref<16x256xf32, #tpu.memory_space<vmem>>, %arg3: memref<256x512xbf16, #tpu.memory_space<vmem>>, %arg4: memref<1x512xf32, #tpu.memory_space<vmem>>, %arg5: memref<128x128xf32, #tpu.memory_space<vmem>>, %arg6: memref<16x128xf32, #tpu.memory_space<vmem>>, %arg7: memref<16x512xf32, #tpu.memory_space<vmem>>) attributes {dimension_semantics = [#tpu.dimension_semantics<parallel>, #tpu.dimension_semantics<arbitrary>], iteration_bounds = array<i64: 1, 1>, scalar_prefetch = 0 : i64, scratch_operands = 1 : i64, tpu.core_type = #tpu.core_type<tc>, window_params = [{transform_indices = @transform_0, window_bounds = array<i64: 16, 256>}, {transform_indices = @transform_1, window_bounds = array<i64: 256, 512>}, {pipeline_mode = #tpu.pipeline_mode<synchronous>, transform_indices = @transform_2, window_bounds = array<i64: 1, 512>}, {pipeline_mode = #tpu.pipeline_mode<synchronous>, transform_indices = @transform_3, window_bounds = array<i64: 128, 128>}, {transform_indices = @transform_4, window_bounds = array<i64: 16, 128>}]} {
    %c0_i32 = arith.constant 0 : i32
    %0 = arith.cmpi eq, %arg1, %c0_i32 : i32
    %1 = arith.extui %0 : i1 to i32
    %c0_i32_0 = arith.constant 0 : i32
    %2 = arith.cmpi ne, %1, %c0_i32_0 : i32
    scf.if %2 {
      %c0_10 = arith.constant 0 : index
      %c0_11 = arith.constant 0 : index
      %13 = vector.load %arg4[%c0_10, %c0_11] : memref<1x512xf32, #tpu.memory_space<vmem>>, vector<1x512xf32>
      %14 = vector.shape_cast %13 : vector<1x512xf32> to vector<1x512xf32>
      %15 = vector.broadcast %14 : vector<1x512xf32> to vector<16x512xf32>
      %c0_12 = arith.constant 0 : index
      %c0_13 = arith.constant 0 : index
      %16 = vector.load %arg7[%c0_12, %c0_13] : memref<16x512xf32, #tpu.memory_space<vmem>>, vector<16x512xf32>
      tpu.vector_store %arg7[%c0_12, %c0_13], %15 {strides = array<i32>} : memref<16x512xf32, #tpu.memory_space<vmem>>, vector<16x512xf32>,
    } else {
    }
    %c0 = arith.constant 0 : index
    %c0_1 = arith.constant 0 : index
    %3 = vector.load %arg7[%c0, %c0_1] : memref<16x512xf32, #tpu.memory_space<vmem>>, vector<16x512xf32>
    %c0_2 = arith.constant 0 : index
    %c0_3 = arith.constant 0 : index
    %4 = vector.load %arg2[%c0_2, %c0_3] : memref<16x256xf32, #tpu.memory_space<vmem>>, vector<16x256xf32>
    %5 = arith.truncf %4 : vector<16x256xf32> to vector<16x256xbf16>
    %c0_4 = arith.constant 0 : index
    %c0_5 = arith.constant 0 : index
    %6 = vector.load %arg3[%c0_4, %c0_5] : memref<256x512xbf16, #tpu.memory_space<vmem>>, vector<256x512xbf16>
    %cst = arith.constant dense<0.000000e+00> : vector<16x512xf32>
    %7 = tpu.matmul %5, %6, %cst {dimension_numbers = #tpu.dot_dimension_numbers<[1], [0], [0], [1], [0, 0, 1, 1], [], []>} : vector<16x256xbf16>, vector<256x512xbf16>, vector<16x512xf32> -> vector<16x512xf32>
    %8 = arith.addf %3, %7 : vector<16x512xf32>
    %c0_6 = arith.constant 0 : index
    %c0_7 = arith.constant 0 : index
    %9 = vector.load %arg7[%c0_6, %c0_7] : memref<16x512xf32, #tpu.memory_space<vmem>>, vector<16x512xf32>
    tpu.vector_store %arg7[%c0_6, %c0_7], %8 {strides = array<i32>} : memref<16x512xf32, #tpu.memory_space<vmem>>, vector<16x512xf32>,
    %c0_i32_8 = arith.constant 0 : i32
    %10 = arith.cmpi eq, %arg1, %c0_i32_8 : i32
    %11 = arith.extui %10 : i1 to i32
    %c0_i32_9 = arith.constant 0 : i32
    %12 = arith.cmpi ne, %11, %c0_i32_9 : i32
    scf.if %12 {
      %c0_10 = arith.constant 0 : index
      %c0_11 = arith.constant 0 : index
      %13 = vector.load %arg7[%c0_10, %c0_11] : memref<16x512xf32, #tpu.memory_space<vmem>>, vector<16x512xf32>
      %14 = vector.extract_strided_slice %13 {offsets = [0, 0], sizes = [16, 128], strides = [1, 1]} : vector<16x512xf32> to vector<16x128xf32>
      %15 = vector.extract_strided_slice %13 {offsets = [0, 128], sizes = [16, 128], strides = [1, 1]} : vector<16x512xf32> to vector<16x128xf32>
      %16 = arith.maximumf %14, %15 : vector<16x128xf32>
      %17 = vector.extract_strided_slice %13 {offsets = [0, 256], sizes = [16, 128], strides = [1, 1]} : vector<16x512xf32> to vector<16x128xf32>
      %18 = arith.maximumf %16, %17 : vector<16x128xf32>
      %19 = vector.extract_strided_slice %13 {offsets = [0, 384], sizes = [16, 128], strides = [1, 1]} : vector<16x512xf32> to vector<16x128xf32>
      %20 = arith.maximumf %18, %19 : vector<16x128xf32>
      %c0_12 = arith.constant 0 : index
      %c0_13 = arith.constant 0 : index
      %21 = vector.load %arg5[%c0_12, %c0_13] : memref<128x128xf32, #tpu.memory_space<vmem>>, vector<128x128xf32>
      %cst_14 = arith.constant dense<0.000000e+00> : vector<16x128xf32>
      %22 = tpu.matmul %20, %21, %cst_14 {dimension_numbers = #tpu.dot_dimension_numbers<[1], [0], [0], [1], [0, 0, 1, 1], [], []>} : vector<16x128xf32>, vector<128x128xf32>, vector<16x128xf32> -> vector<16x128xf32>
      %c0_15 = arith.constant 0 : index
      %c0_16 = arith.constant 0 : index
      %23 = vector.load %arg6[%c0_15, %c0_16] : memref<16x128xf32, #tpu.memory_space<vmem>>, vector<16x128xf32>
      tpu.vector_store %arg6[%c0_15, %c0_16], %22 {strides = array<i32>} : memref<16x128xf32, #tpu.memory_space<vmem>>, vector<16x128xf32>,
    } else {
    }
    return
  }
  func.func @transform_0(%arg0: i32, %arg1: i32) -> (i32, i32) {
    %c0_i32 = arith.constant 0 : i32
    return %arg0, %arg1 : i32, i32
  }
  func.func @transform_1(%arg0: i32, %arg1: i32) -> (i32, i32) {
    %c0_i32 = arith.constant 0 : i32
    %c0_i32_0 = arith.constant 0 : i32
    return %arg1, %c0_i32 : i32, i32
  }
  func.func @transform_2(%arg0: i32, %arg1: i32) -> (i32, i32) {
    %c0_i32 = arith.constant 0 : i32
    %c0_i32_0 = arith.constant 0 : i32
    %c0_i32_1 = arith.constant 0 : i32
    return %c0_i32, %c0_i32_0 : i32, i32
  }
  func.func @transform_3(%arg0: i32, %arg1: i32) -> (i32, i32) {
    %c0_i32 = arith.constant 0 : i32
    %c0_i32_0 = arith.constant 0 : i32
    %c0_i32_1 = arith.constant 0 : i32
    return %c0_i32, %c0_i32_0 : i32, i32
  }
  func.func @transform_4(%arg0: i32, %arg1: i32) -> (i32, i32) {
    %c0_i32 = arith.constant 0 : i32
    %c0_i32_0 = arith.constant 0 : i32
    return %arg0, %c0_i32 : i32, i32
  }
}

</mosaic_0001>

<bundles_post_ra>
// kernel: tpu_custom_call.1
= control target key start
LH: loop header
LB: loop body
LE: loop exit
PB: predicated region body
PF: predicated region fallthrough
CT: control target
= control target key end

     0   :  { %9 = vsyncpa [#allocation4], 0  ;;  %s1119_s0 = inlined_call_operand.hbm [shape: f32[16,256], index: 0, kind: input, shape index: {}]   ;;  %s1120_s1 = inlined_call_operand.hbm [shape: bf16[256,512], index: 1, kind: input, shape index: {}]   ;;  %s1121_s2 = inlined_call_operand.hbm [shape: f32[1,512], index: 2, kind: input, shape index: {}]   ;;  %s1122_s3 = inlined_call_operand.hbm [shape: f32[128,128], index: 3, kind: input, shape index: {}]   ;;  %s1123_s4 = inlined_call_operand.hbm [shape: f32[16,128], index: 4, kind: output, shape index: {}]  }
   0x1   :  { %10 = vsyncpa [#allocation7], 0 }
   0x2   :  { %11 = vsyncpa [#allocation10], 0 }
   0x3   :  { %12 = vsyncpa [#allocation5], 0  ;;  %s1064_s15 = smov [#allocation6]   ;;  %s1065_s17 = smov [#allocation3]  }
   0x4   :  { %s30_s16 = sshll.u32 %s1064_s15, 4  ;;  %s18_s18 = sshll.u32 %s1065_s17, 4  ;;  %s31_s16 = int_to_ptr.vmem [resolvable:$true] %s30_s16  ;;  %s19_s18 = int_to_ptr.vmem [resolvable:$true] %s18_s18 }
   0x5   :  { %s964_s19 = scalar_lea.vmem %s31_s16, 8192  ;;  %p969_p1 = scmp.lt.s32.totalorder %s31_s16, %s31_s16 }
   0x6   :  { %p965_p0 = scmp.ne.s32.totalorder %s31_s16, %s964_s19  ;;  %p970_p2 = scmp.lt.s32.totalorder %s964_s19, %s964_s19 }
   0x8   :  { %p971_p3 = por %p970_p2, %p969_p1 }
   0xa   :  { %p972_p4 = pnand %p971_p3, %p965_p0 }
   0xc   :  { %975 = shalt.err (!%p972_p4)
}
   0xd   :  { %s1066_s20 = smov 256   ;;  %s1067_s21 = smov 16  }
   0xe   :  { %36 = dma.hbm_to_vmem [thread:$0]  %s1120_s1, 8192, %s31_s16, [#allocation7], %s1066_s20, %s1066_s20, %s1067_s21  }
   0xf   :  { %s984_s24 = scalar_lea.vmem %s19_s18, 512  ;;  %p989_p6 = scmp.lt.s32.totalorder %s19_s18, %s19_s18 }
  0x10   :  { %p985_p5 = scmp.ne.s32.totalorder %s19_s18, %s984_s24  ;;  %p990_p7 = scmp.lt.s32.totalorder %s984_s24, %s984_s24 }
  0x12   :  { %p991_p8 = por %p990_p7, %p989_p6 }
  0x14   :  { %p992_p9 = pnand %p991_p8, %p985_p5 }
  0x16   :  { %995 = shalt.err (!%p992_p9)
}
  0x17   :  { %24 = dma.hbm_to_vmem [thread:$0]  %s1119_s0, 512, %s19_s18, [#allocation4], %s1066_s20, %s1066_s20, %s1067_s21  }
  0x18   :  { %s1068_s27 = smov [#allocation8]   ;;  %s1069_s29 = smov [#allocation9]  }
  0x19   :  { %s43_s28 = sshll.u32 %s1068_s27, 4  ;;  %s52_s30 = sshll.u32 %s1069_s29, 4  ;;  %s44_s28 = int_to_ptr.vmem [resolvable:$true] %s43_s28  ;;  %s53_s30 = int_to_ptr.vmem [resolvable:$true] %s52_s30 }
  0x1a   :  { %s1004_s5 = scalar_lea.vmem %s44_s28, 64  ;;  %p1009_p11 = scmp.lt.s32.totalorder %s44_s28, %s44_s28 }
  0x1b   :  { %p1005_p10 = scmp.ne.s32.totalorder %s44_s28, %s1004_s5  ;;  %p1010_p12 = scmp.lt.s32.totalorder %s1004_s5, %s1004_s5 }
  0x1d   :  { %p1011_p13 = por %p1010_p12, %p1009_p11 }
  0x1f   :  { %p1012_p0 = pnand %p1011_p13, %p1005_p10 }
  0x21   :  { %1015 = shalt.err (!%p1012_p0)
}
  0x22   :  { %46 = dma.hbm_to_vmem [thread:$0]  %s1121_s2, 64, %s44_s28, [#allocation7]  }
  0x23   :  { %s1024_s7 = scalar_lea.vmem %s53_s30, 2048  ;;  %p1029_p2 = scmp.lt.s32.totalorder %s53_s30, %s53_s30 }
  0x24   :  { %p1025_p1 = scmp.ne.s32.totalorder %s53_s30, %s1024_s7  ;;  %p1030_p3 = scmp.lt.s32.totalorder %s1024_s7, %s1024_s7 }
  0x26   :  { %p1031_p4 = por %p1030_p3, %p1029_p2 }
  0x28   :  { %p1032_p5 = pnand %p1031_p4, %p1025_p1 }
  0x2a   :  { %1035 = shalt.err (!%p1032_p5)
}
  0x2b   :  { %s1070_s0 = smov 128   ;;  %s1071_s8 = smov 8  }
  0x2c   :  { %58 = dma.hbm_to_vmem [thread:$0]  %s1122_s3, 2048, %s53_s30, [#allocation10], %s1070_s0, %s1070_s0, %s1071_s8  }
  0x2d   :  { %1056 = dma.done.wait [#allocation4], 512  }
  0x2e   :  { %1057 = vsyncadd [#allocation4], 4294966784 }
  0x2f   :  { %1058 = dma.done.wait [#allocation7], 8256  }
  0x30   :  { %1059 = vsyncadd [#allocation7], 4294959040 }
  0x31   :  { %1060 = dma.done.wait [#allocation10], 2048  }
  0x32   :  { %1061 = vsyncadd [#allocation10], 4294965248  ;;  %v860_v0 = vld [vmem:[#allocation6 + $0xe4] ss:$16 sps:$4 sm:$0xff]   ;;  %v862_v1 = vld [vmem:[#allocation6 + $0xec] ss:$16 sps:$4 sm:$0xff]  }
  0x33   :  { %503 = vmatprep.subr.bf16.mxu0 %v860_v0  ;;  %v864_v2 = vld [vmem:[#allocation6 + $0xe0] ss:$16 sps:$4 sm:$0xff]   ;;  %v865_v3 = vld [vmem:[#allocation6 + $0xe8] ss:$16 sps:$4 sm:$0xff]   ;;  %546 = vmatprep.subr.bf16.mxu1 %v862_v1  ;;  %v866_v4 = vld [vmem:[#allocation6 + $0xc4] ss:$16 sps:$4 sm:$0xff]  }
  0x34   :  { %504 = vmatpush1.bf16.msra.mxu0 %v864_v2  ;;  %547 = vmatpush1.bf16.msra.mxu1 %v865_v3  ;;  %v868_v5 = vld [vmem:[#allocation6 + $0xcc] ss:$16 sps:$4 sm:$0xff]   ;;  %v870_v6 = vld [vmem:[#allocation6 + $0xc0] ss:$16 sps:$4 sm:$0xff]   ;;  %v871_v7 = vld [vmem:[#allocation6 + $0xc8] ss:$16 sps:$4 sm:$0xff]  }
  0x35   :  { %505 = vmatprep.subr.bf16.mxu0 %v866_v4  ;;  %548 = vmatprep.subr.bf16.mxu1 %v868_v5  ;;  %v872_v8 = vld [vmem:[#allocation6 + $0xa4] ss:$16 sps:$4 sm:$0xff]   ;;  %v874_v9 = vld [vmem:[#allocation6 + $0xac] ss:$16 sps:$4 sm:$0xff]   ;;  %v876_v10 = vld [vmem:[#allocation6 + $0xa0] ss:$16 sps:$4 sm:$0xff]  }
  0x36   :  { %v877_v11 = vld [vmem:[#allocation6 + $0xa8] ss:$16 sps:$4 sm:$0xff]   ;;  %v878_v12 = vld [vmem:[#allocation6 + $0x84] ss:$16 sps:$4 sm:$0xff]   ;;  %v880_v13 = vld [vmem:[#allocation6 + $0x8c] ss:$16 sps:$4 sm:$0xff]  }
  0x37   :  { %v882_v14 = vld [vmem:[#allocation6 + $0x80] ss:$16 sps:$4 sm:$0xff]   ;;  %v883_v15 = vld [vmem:[#allocation6 + $0x88] ss:$16 sps:$4 sm:$0xff]   ;;  %v884_v16 = vld [vmem:[#allocation6 + $0x64] ss:$16 sps:$4 sm:$0xff]  }
  0x38   :  { %506 = vmatpush1.bf16.msra.mxu0 %v870_v6  ;;  %549 = vmatpush1.bf16.msra.mxu1 %v871_v7  ;;  %v886_v17 = vld [vmem:[#allocation6 + $0x6c] ss:$16 sps:$4 sm:$0xff]   ;;  %v888_v18 = vld [vmem:[#allocation6 + $0x60] ss:$16 sps:$4 sm:$0xff]   ;;  %v889_v19 = vld [vmem:[#allocation6 + $0x68] ss:$16 sps:$4 sm:$0xff]  }
  0x39   :  { %507 = vmatprep.subr.bf16.mxu0 %v872_v8  ;;  %550 = vmatprep.subr.bf16.mxu1 %v874_v9  ;;  %v890_v20 = vld [vmem:[#allocation6 + $0x44] ss:$16 sps:$4 sm:$0xff]   ;;  %v892_v21 = vld [vmem:[#allocation6 + $0x4c] ss:$16 sps:$4 sm:$0xff]   ;;  %v894_v22 = vld [vmem:[#allocation6 + $0x40] ss:$16 sps:$4 sm:$0xff]  }
  0x3a   :  { %v895_v23 = vld [vmem:[#allocation6 + $0x48] ss:$16 sps:$4 sm:$0xff]   ;;  %v896_v24 = vld [vmem:[#allocation6 + $0x24] ss:$16 sps:$4 sm:$0xff]   ;;  %v898_v25 = vld [vmem:[#allocation6 + $0x2c] ss:$16 sps:$4 sm:$0xff]  }
  0x3b   :  { %v900_v26 = vld [vmem:[#allocation6 + $0x20] ss:$16 sps:$4 sm:$0xff]   ;;  %v901_v27 = vld [vmem:[#allocation6 + $0x28] ss:$16 sps:$4 sm:$0xff]   ;;  %v902_v28 = vld [vmem:[#allocation6 + $0x4] ss:$16 sps:$4 sm:$0xff]  }
  0x3c   :  { %508 = vmatpush1.bf16.msra.mxu0 %v876_v10  ;;  %551 = vmatpush1.bf16.msra.mxu1 %v877_v11  ;;  %v904_v29 = vld [vmem:[#allocation6 + $0xc] ss:$16 sps:$4 sm:$0xff]   ;;  %v906_v30 = vld [vmem:[#allocation6] ss:$16 sps:$4 sm:$0xff]   ;;  %v907_v31 = vld [vmem:[#allocation6 + $0x8] ss:$16 sps:$4 sm:$0xff]  }
  0x3d   :  { %509 = vmatprep.subr.bf16.mxu0 %v878_v12  ;;  %552 = vmatprep.subr.bf16.mxu1 %v880_v13  ;;  %v908_v32 = vld [vmem:[#allocation6 + $0x1e4] ss:$16 sps:$4 sm:$0xff]   ;;  %v910_v33 = vld [vmem:[#allocation6 + $0x1ec] ss:$16 sps:$4 sm:$0xff]   ;;  %v912_v34 = vld [vmem:[#allocation6 + $0x1e0] ss:$16 sps:$4 sm:$0xff]  }
  0x3e   :  { %v913_v35 = vld [vmem:[#allocation6 + $0x1e8] ss:$16 sps:$4 sm:$0xff]   ;;  %v914_v36 = vld [vmem:[#allocation6 + $0x1c4] ss:$16 sps:$4 sm:$0xff]   ;;  %v916_v37 = vld [vmem:[#allocation6 + $0x1cc] ss:$16 sps:$4 sm:$0xff]  }
  0x3f   :  { %v918_v38 = vld [vmem:[#allocation6 + $0x1c0] ss:$16 sps:$4 sm:$0xff]   ;;  %v919_v39 = vld [vmem:[#allocation6 + $0x1c8] ss:$16 sps:$4 sm:$0xff]   ;;  %v920_v40 = vld [vmem:[#allocation6 + $0x1a4] ss:$16 sps:$4 sm:$0xff]  }
  0x40   :  { %510 = vmatpush1.bf16.msra.mxu0 %v882_v14  ;;  %553 = vmatpush1.bf16.msra.mxu1 %v883_v15  ;;  %v922_v41 = vld [vmem:[#allocation6 + $0x1ac] ss:$16 sps:$4 sm:$0xff]   ;;  %v924_v42 = vld [vmem:[#allocation6 + $0x1a0] ss:$16 sps:$4 sm:$0xff]   ;;  %v925_v43 = vld [vmem:[#allocation6 + $0x1a8] ss:$16 sps:$4 sm:$0xff]  }
  0x41   :  { %511 = vmatprep.subr.bf16.mxu0 %v884_v16  ;;  %554 = vmatprep.subr.bf16.mxu1 %v886_v17  ;;  %v926_v44 = vld [vmem:[#allocation6 + $0x184] ss:$16 sps:$4 sm:$0xff]   ;;  %v928_v45 = vld [vmem:[#allocation6 + $0x18c] ss:$16 sps:$4 sm:$0xff]   ;;  %v930_v48 = vld [vmem:[#allocation6 + $0x180] ss:$16 sps:$4 sm:$0xff]  }
  0x42   :  { %v114_v46 = vld [vmem:[#allocation3 + $0x8] sm:$0xff]  ;;  %v116_v47 = vld [vmem:[#allocation3 + $0x18] sm:$0xff]  ;;  %v932_v51 = vld [vmem:[#allocation6 + $0x164] ss:$16 sps:$4 sm:$0xff]   ;;  %s1072_s2 = smov [#allocation11]  }
  0x43   :  { %v931_v49 = vld [vmem:[#allocation6 + $0x188] ss:$16 sps:$4 sm:$0xff]   ;;  %v118_v50 = vpack.c.bf16 %v116_v47, %v114_v46  ;;  %v934_v52 = vld [vmem:[#allocation6 + $0x16c] ss:$16 sps:$4 sm:$0xff]   ;;  %v936_v53 = vld [vmem:[#allocation6 + $0x160] ss:$16 sps:$4 sm:$0xff]  }
  0x44   :  { %512 = vmatpush1.bf16.msra.mxu0 %v888_v18  ;;  %555 = vmatpush1.bf16.msra.mxu1 %v889_v19  ;;  %v937_v54 = vld [vmem:[#allocation6 + $0x168] ss:$16 sps:$4 sm:$0xff]   ;;  %v938_v55 = vld [vmem:[#allocation6 + $0x144] ss:$16 sps:$4 sm:$0xff]   ;;  %v940_v56 = vld [vmem:[#allocation6 + $0x14c] ss:$16 sps:$4 sm:$0xff]  }
  0x45   :  { %513 = vmatprep.subr.bf16.mxu0 %v890_v20  ;;  %556 = vmatprep.subr.bf16.mxu1 %v892_v21  ;;  %v942_v57 = vld [vmem:[#allocation6 + $0x140] ss:$16 sps:$4 sm:$0xff]   ;;  %v943_v58 = vld [vmem:[#allocation6 + $0x148] ss:$16 sps:$4 sm:$0xff]   ;;  %v944_v59 = vld [vmem:[#allocation6 + $0x124] ss:$16 sps:$4 sm:$0xff]  }
  0x46   :  { %535 = vmatprep.mubr.bf16.mxu0 %v118_v50  ;;  %578 = vmatprep.mubr.bf16.mxu1 %v118_v50  ;;  %v946_v60 = vld [vmem:[#allocation6 + $0x12c] ss:$16 sps:$4 sm:$0xff]   ;;  %v948_v61 = vld [vmem:[#allocation6 + $0x120] ss:$16 sps:$4 sm:$0xff]   ;;  %v949_v62 = vld [vmem:[#allocation6 + $0x128] ss:$16 sps:$4 sm:$0xff]  }
  0x47   :  { %v950_v63 = vld [vmem:[#allocation6 + $0x104] ss:$16 sps:$4 sm:$0xff]   ;;  %v952_v0 = vld [vmem:[#allocation6 + $0x10c] ss:$16 sps:$4 sm:$0xff]   ;;  %v954_v1 = vld [vmem:[#allocation6 + $0x100] ss:$16 sps:$4 sm:$0xff]  }
  0x48   :  { %514 = vmatpush1.bf16.msra.mxu0 %v894_v22  ;;  %557 = vmatpush1.bf16.msra.mxu1 %v895_v23  ;;  %v955_v2 = vld [vmem:[#allocation6 + $0x108] ss:$16 sps:$4 sm:$0xff]   ;;  %v113_v3 = vld [vmem:[#allocation3] sm:$0xff]  ;;  %v115_v4 = vld [vmem:[#allocation3 + $0x10] sm:$0xff]  ;;  %v77_v22 = vlaneseq  ;;  %s720_s3 = sshll.u32 %s1072_s2, 4  ;;  %s721_s3 = int_to_ptr.vmem [resolvable:$true] %s720_s3 }
  0x49   :  { %515 = vmatprep.subr.bf16.mxu0 %v896_v24  ;;  %558 = vmatprep.subr.bf16.mxu1 %v898_v25  ;;  %v637_v5 = vld [vmem:[#allocation9 + $0x78] sm:$0xff]  ;;  %v117_v6 = vpack.c.bf16 %v115_v4, %v113_v3  ;;  %v636_v7 = vld [vmem:[#allocation9 + $0x70] sm:$0xff]  ;;  %v635_v8 = vld [vmem:[#allocation9 + $0x68] sm:$0xff]  ;;  %s1036_s11 = scalar_lea.vmem %s721_s3, 256  ;;  %p1041_p7 = scmp.lt.s32.totalorder %s721_s3, %s721_s3 }
  0x4a   :  { %v634_v9 = vld [vmem:[#allocation9 + $0x60] sm:$0xff]  ;;  %v633_v10 = vld [vmem:[#allocation9 + $0x58] sm:$0xff]  ;;  %v632_v11 = vld [vmem:[#allocation9 + $0x50] sm:$0xff]  ;;  %v78_v23 = vshrl.u32 %v77_v22, 7  ;;  %p1037_p6 = scmp.ne.s32.totalorder %s721_s3, %s1036_s11  ;;  %p1042_p8 = scmp.lt.s32.totalorder %s1036_s11, %s1036_s11 }
  0x4b   :  { %v631_v12 = vld [vmem:[#allocation9 + $0x48] sm:$0xff]  ;;  %v630_v13 = vld [vmem:[#allocation9 + $0x40] sm:$0xff]  ;;  %v629_v14 = vld [vmem:[#allocation9 + $0x38] sm:$0xff] }
  0x4c   :  { %516 = vmatpush1.bf16.msra.mxu0 %v900_v26  ;;  %559 = vmatpush1.bf16.msra.mxu1 %v901_v27  ;;  %v628_v15 = vld [vmem:[#allocation9 + $0x30] sm:$0xff]  ;;  %v627_v16 = vld [vmem:[#allocation9 + $0x28] sm:$0xff]  ;;  %v626_v17 = vld [vmem:[#allocation9 + $0x20] sm:$0xff]  ;;  %v79_v24 = vsub.s32 0, %v78_v23  ;;  %v87_v25 = vsub.s32 2, %v78_v23  ;;  %v83_v26 = vsub.s32 1, %v78_v23  ;;  %p1043_p9 = por %p1042_p8, %p1041_p7 }
  0x4d   :  { %517 = vmatprep.subr.bf16.mxu0 %v902_v28  ;;  %560 = vmatprep.subr.bf16.mxu1 %v904_v29  ;;  %v625_v18 = vld [vmem:[#allocation9 + $0x18] sm:$0xff]  ;;  %v624_v19 = vld [vmem:[#allocation9 + $0x10] sm:$0xff]  ;;  %v623_v20 = vld [vmem:[#allocation9 + $0x8] sm:$0xff] }
  0x4e   :  { %v622_v21 = vld [vmem:[#allocation9] sm:$0xff]  ;;  %v75_v27 = vld [vmem:[#allocation8] sm:$0xf]  ;;  %p1044_p10 = pnand %p1043_p9, %p1037_p6 }
  0x4f   :  { %v80_v28 = vrot.slane %v75_v27, %v79_v24  ;;  %v88_v29 = vrot.slane %v75_v27, %v87_v25 }
  0x50   :  { %518 = vmatpush1.bf16.msra.mxu0 %v906_v30  ;;  %561 = vmatpush1.bf16.msra.mxu1 %v907_v31  ;;  %v84_v30 = vrot.slane %v75_v27, %v83_v26  ;;  %v91_v31 = vsub.s32 3, %v78_v23 }
  0x51   :  { %519 = vmatprep.subr.bf16.mxu0 %v908_v32  ;;  %562 = vmatprep.subr.bf16.mxu1 %v910_v33 }
  0x54   :  { %520 = vmatpush2.bf16.msra.mxu0 %v912_v34  ;;  %563 = vmatpush2.bf16.msra.mxu1 %v913_v35 }
  0x55   :  { %521 = vmatprep.subr.bf16.mxu0 %v914_v36  ;;  %564 = vmatprep.subr.bf16.mxu1 %v916_v37 }
  0x58   :  { %522 = vmatpush2.bf16.msra.mxu0 %v918_v38  ;;  %565 = vmatpush2.bf16.msra.mxu1 %v919_v39  ;;  %v92_v39 = vrot.slane %v75_v27, %v91_v31 }
  0x59   :  { %523 = vmatprep.subr.bf16.mxu0 %v920_v40  ;;  %566 = vmatprep.subr.bf16.mxu1 %v922_v41 }
  0x5c   :  { %524 = vmatpush2.bf16.msra.mxu0 %v924_v42  ;;  %567 = vmatpush2.bf16.msra.mxu1 %v925_v43 }
  0x5d   :  { %525 = vmatprep.subr.bf16.mxu0 %v926_v44  ;;  %568 = vmatprep.subr.bf16.mxu1 %v928_v45 }
  0x60   :  { %526 = vmatpush2.bf16.msra.mxu0 %v930_v48  ;;  %569 = vmatpush2.bf16.msra.mxu1 %v931_v49 }
  0x61   :  { %527 = vmatprep.subr.bf16.mxu0 %v932_v51  ;;  %570 = vmatprep.subr.bf16.mxu1 %v934_v52 }
  0x64   :  { %528 = vmatpush2.bf16.msra.mxu0 %v936_v53  ;;  %571 = vmatpush2.bf16.msra.mxu1 %v937_v54 }
  0x65   :  { %529 = vmatprep.subr.bf16.mxu0 %v938_v55  ;;  %572 = vmatprep.subr.bf16.mxu1 %v940_v56 }
  0x68   :  { %530 = vmatpush2.bf16.msra.mxu0 %v942_v57  ;;  %573 = vmatpush2.bf16.msra.mxu1 %v943_v58 }
  0x69   :  { %531 = vmatprep.subr.bf16.mxu0 %v944_v59  ;;  %574 = vmatprep.subr.bf16.mxu1 %v946_v60 }
  0x6c   :  { %532 = vmatpush2.bf16.msra.mxu0 %v948_v61  ;;  %575 = vmatpush2.bf16.msra.mxu1 %v949_v62 }
  0x6d   :  { %533 = vmatprep.subr.bf16.mxu0 %v950_v63  ;;  %576 = vmatprep.subr.bf16.mxu1 %v952_v0 }
  0x70   :  { %534 = vmatpush2.bf16.msra.mxu0 %v954_v1  ;;  %577 = vmatpush2.bf16.msra.mxu1 %v955_v2 }
  0x71   :  { %816 = vmatprep.subr.mxu0 %v637_v5 }
  0x73   :  { %536 = vmatmul.mubr.bf16.vlgmr.msra.gmra.mxu0 %v117_v6  ;;  %579 = vmatmul.mubr.bf16.vlgmr.msra.gmra.mxu1 %v117_v6 }
  0x74   :  { %817 = vmatpush3.msra.mxu0 %v637_v5 }
  0x75   :  { %818 = vmatprep.subr.mxu0 %v636_v7 }
  0x76   :  { %819 = vmatpush3.msra.mxu0 %v636_v7 }
  0x77   :  { %820 = vmatprep.subr.mxu0 %v635_v8 }
  0x78   :  { %821 = vmatpush3.msra.mxu0 %v635_v8 }
  0x79   :  { %822 = vmatprep.subr.mxu0 %v634_v9 }
  0x7a   :  { %823 = vmatpush3.msra.mxu0 %v634_v9 }
  0x7b   :  { %824 = vmatprep.subr.mxu0 %v633_v10 }
  0x7c   :  { %825 = vmatpush3.msra.mxu0 %v633_v10 }
  0x7d   :  { %826 = vmatprep.subr.mxu0 %v632_v11 }
  0x7e   :  { %827 = vmatpush3.msra.mxu0 %v632_v11 }
  0x7f   :  { %828 = vmatprep.subr.mxu0 %v631_v12 }
  0x80   :  { %829 = vmatpush3.msra.mxu0 %v631_v12 }
  0x81   :  { %830 = vmatprep.subr.mxu0 %v630_v13 }
  0x82   :  { %831 = vmatpush3.msra.mxu0 %v630_v13 }
  0x83   :  { %832 = vmatprep.subr.mxu0 %v629_v14 }
  0x84   :  { %833 = vmatpush3.msra.mxu0 %v629_v14 }
  0x85   :  { %834 = vmatprep.subr.mxu0 %v628_v15 }
  0x86   :  { %835 = vmatpush3.msra.mxu0 %v628_v15 }
  0x87   :  { %836 = vmatprep.subr.mxu0 %v627_v16 }
  0x88   :  { %837 = vmatpush3.msra.mxu0 %v627_v16 }
  0x89   :  { %838 = vmatprep.subr.mxu0 %v626_v17 }
  0x8a   :  { %839 = vmatpush3.msra.mxu0 %v626_v17 }
  0x8b   :  { %840 = vmatprep.subr.mxu0 %v625_v18 }
  0x8c   :  { %841 = vmatpush3.msra.mxu0 %v625_v18 }
  0x8d   :  { %842 = vmatprep.subr.mxu0 %v624_v19 }
  0x8e   :  { %843 = vmatpush3.msra.mxu0 %v624_v19 }
  0x8f   :  { %844 = vmatprep.subr.mxu0 %v623_v20 }
  0x90   :  { %845 = vmatpush3.msra.mxu0 %v623_v20 }
  0x91   :  { %846 = vmatprep.subr.mxu0 %v622_v21 }
  0x92   :  { %847 = vmatpush3.msra.mxu0 %v622_v21 }
 0x133   :  { %v537_v32 = vpop.f32.mrf.mxu0  ;;  %v580_v33 = vpop.f32.mrf.mxu1 }
 0x134   :  { %v589_v36 = vadd.f32 %v537_v32, %v80_v28  ;;  %v591_v37 = vadd.f32 %v580_v33, %v88_v29 }
 0x135   :  { %v539_v34 = vpop.f32.mrf.mxu0  ;;  %v582_v35 = vpop.f32.mrf.mxu1 }
 0x136   :  { %v590_v38 = vadd.f32 %v539_v34, %v84_v30  ;;  %v592_v44 = vadd.f32 %v582_v35, %v92_v39 }
 0x137   :  { %v541_v40 = vpop.f32.mrf.mxu0  ;;  %v584_v41 = vpop.f32.mrf.mxu1 }
 0x138   :  { %v616_v42 = vmax.f32 %v589_v36, %v590_v38  ;;  %v593_v46 = vadd.f32 %v541_v40, %v80_v28  ;;  %v595_v50 = vadd.f32 %v584_v41, %v88_v29 }
 0x139   :  { %v543_v43 = vpop.f32.mrf.mxu0  ;;  %v586_v48 = vpop.f32.mrf.mxu1 }
 0x13a   :  { %v618_v45 = vmax.f32 %v616_v42, %v591_v37  ;;  %v594_v47 = vadd.f32 %v543_v43, %v84_v30  ;;  %v596_v52 = vadd.f32 %v586_v48, %v92_v39 }
 0x13c   :  { %v620_v49 = vmax.f32 %v618_v45, %v592_v44  ;;  %v617_v51 = vmax.f32 %v593_v46, %v594_v47 }
 0x13e   :  { %v619_v53 = vmax.f32 %v617_v51, %v595_v50  ;;  %848 = vmatprep.mubr.f32.mxu0 %v620_v49 }
 0x140   :  { %v621_v54 = vmax.f32 %v619_v53, %v596_v52 }
 0x142   :  { %849 = vmatmul.mubr.f32.vlgmr.msra.gmra.mxu0 %v621_v54 }
 0x202   :  { %v850_v55 = vpop.f32.mrf.mxu0 }
 0x203   :  { %714 = vst [vmem:[#allocation11 + $0x8] sm:$0xff] %v850_v55 }
 0x204   :  { %v704_v56 = vpop.f32.mrf.mxu0 }
 0x205   :  { %713 = vst [vmem:[#allocation11] sm:$0xff] %v704_v56 }
 0x206   :  { %1047 = shalt.err (!%p1044_p10)
}
 0x207   :  { %726 = dma.vmem_to_hbm [thread:$0]  %s721_s3, 256, %s1123_s4, [#allocation5], %s1070_s0, %s1070_s0, %s1071_s8  }
 0x208   :  { %1062 = dma.done.wait [#allocation5], 256  }
 0x209   :  { %1063 = vsyncadd [#allocation5], 4294967040 }
 0x20a   :  { %730 = vsyncpa [#allocation4], 1 }
 0x20b   :  { %731 = vsyncpa [#allocation7], 1 }
 0x20c   :  { %732 = vsyncpa [#allocation10], 1 }
 0x20d   :  { %733 = vsyncpa [#allocation5], 1 }

</bundles_post_ra>
